<compile_context>
chip_gen: v5e
topology: v5e:2x2
jax: 0.10.0
libtpu: 0.0.40
codegen_flags: <defaults>
</compile_context>

<pallas_src>
import functools

import jax
import jax.numpy as jnp
import numpy as np
from jax.experimental import pallas as pl
from jax.experimental.pallas import tpu as pltpu

LN_EPS = 1e-5
HP = jax.lax.Precision.HIGHEST


def _bdot(a, b):
    """Matmul with bf16 operands and f32 accumulation (MXU fast path)."""
    return jnp.dot(a.astype(jnp.bfloat16), b.astype(jnp.bfloat16),
                   preferred_element_type=jnp.float32)


def _layer_norm(v, g, b):
    mu = jnp.mean(v, axis=-1, keepdims=True)
    var = jnp.mean((v - mu) ** 2, axis=-1, keepdims=True)
    return (v - mu) * jax.lax.rsqrt(var + LN_EPS) * g + b


# ----------------------------------------------------------------------------
# Kernel A: one batch block (S, D) through the TransformerEncoderLayer (post-norm).
# ----------------------------------------------------------------------------
def encoder_kernel(x_ref, wqkv_ref, bqkv_ref, wo_ref, bo_ref,
                   g1_ref, be1_ref, w1_ref, b1_ref, w2_ref, b2_ref,
                   g2_ref, be2_ref, enc_ref, *, D, H):
    Dh = D // H
    x = x_ref[...]                                             # (S, D), f32

    # Fused QKV projection (softmax scale already folded into the Q columns).
    qkv = _bdot(x, wqkv_ref[...]) + bqkv_ref[...]              # (S, 3D), f32
    q, k, v = qkv[:, :D], qkv[:, D:2 * D], qkv[:, 2 * D:]

    # Per-head attention.  H is tiny and static; per-head contexts are collected in
    # vregs and written with a single full-width store (no scratch, no masked vst).
    # TODO(synk): src_mask / src_key_padding_mask are assumed None (as in the spec call).
    ctx = []
    for h in range(H):
        cols = slice(h * Dh, (h + 1) * Dh)
        qh = q[:, cols].astype(jnp.bfloat16)
        kh = k[:, cols].astype(jnp.bfloat16)
        s = jax.lax.dot_general(qh, kh, (((1,), (1,)), ((), ())),
                                preferred_element_type=jnp.float32)   # (S, S)
        m = jnp.max(s, axis=-1, keepdims=True)
        e = jnp.exp(s - m)
        p = e * pl.reciprocal(jnp.sum(e, axis=-1, keepdims=True), approx=True)
        ctx.append(_bdot(p, v[:, cols]))                       # (S, Dh), f32
    ctx = jnp.concatenate(ctx, axis=-1)                        # (S, D)

    attn = _bdot(ctx, wo_ref[...]) + bo_ref[...]

    # Post-norm encoder: residual + LN1, ReLU FFN, residual + LN2 (dropout = identity).
    x1 = _layer_norm(x + attn, g1_ref[...], be1_ref[...])
    h1 = jnp.maximum(_bdot(x1, w1_ref[...]) + b1_ref[...], 0.0)
    h2 = _bdot(h1, w2_ref[...]) + b2_ref[...]
    enc_ref[...] = _layer_norm(x1 + h2, g2_ref[...], be2_ref[...])


# ----------------------------------------------------------------------------
# Kernel B: Conv1d(k=3, padding='same') over the batch axis + ReLU, as one matmul.
# The three taps come in as three shifted views of the zero-padded enc array.
# ----------------------------------------------------------------------------
def conv_kernel(em1_ref, e0_ref, ep1_ref, wc_ref, bc_ref, out_ref):
    cat = jnp.concatenate([em1_ref[...], e0_ref[...], ep1_ref[...]], axis=-1)  # (S, 3D)
    y = _bdot(cat, wc_ref[...]) + bc_ref[...]                                  # K = 3D
    out_ref[...] = jnp.maximum(y, 0.0)    # final ReLU; outer Dropout is identity at eval


# ----------------------------------------------------------------------------
# Parameter construction / preprocessing
# ----------------------------------------------------------------------------
def init_params(key, d_model, dff, num_heads):
    ks = jax.random.split(key, 14)
    s = 0.05
    return {
        'num_heads': num_heads,
        'in_proj_w': s * jax.random.normal(ks[0], (3 * d_model, d_model), jnp.float32),
        'in_proj_b': s * jax.random.normal(ks[1], (3 * d_model,), jnp.float32),
        'out_proj_w': s * jax.random.normal(ks[2], (d_model, d_model), jnp.float32),
        'out_proj_b': s * jax.random.normal(ks[3], (d_model,), jnp.float32),
        'lin1_w': s * jax.random.normal(ks[4], (dff, d_model), jnp.float32),
        'lin1_b': s * jax.random.normal(ks[5], (dff,), jnp.float32),
        'lin2_w': s * jax.random.normal(ks[6], (d_model, dff), jnp.float32),
        'lin2_b': s * jax.random.normal(ks[7], (d_model,), jnp.float32),
        'norm1_g': 1.0 + 0.1 * jax.random.normal(ks[8], (d_model,), jnp.float32),
        'norm1_b': 0.1 * jax.random.normal(ks[9], (d_model,), jnp.float32),
        'norm2_g': 1.0 + 0.1 * jax.random.normal(ks[10], (d_model,), jnp.float32),
        'norm2_b': 0.1 * jax.random.normal(ks[11], (d_model,), jnp.float32),
        'conv_w': s * jax.random.normal(ks[12], (d_model, d_model, 3), jnp.float32),
        'conv_b': s * jax.random.normal(ks[13], (d_model,), jnp.float32),
    }


def _prep_params(p, D):
    """Fuse / transpose / cast parameters exactly the way the kernels consume them."""
    H = p['num_heads']
    Dh = D // H
    scale = 1.0 / float(Dh) ** 0.5
    # PyTorch Linear stores W as (out, in); pre-transpose so the kernel does x @ W.
    wq = p['in_proj_w'][:D].T * scale          # fold softmax scale into Q projection
    wk = p['in_proj_w'][D:2 * D].T
    wv = p['in_proj_w'][2 * D:].T
    bq = p['in_proj_b'][:D] * scale
    bk = p['in_proj_b'][D:2 * D]
    bv = p['in_proj_b'][2 * D:]
    # Conv taps stacked along the contraction dim: [W0; W1; W2] -> (3D, D).
    wc3 = jnp.concatenate([p['conv_w'][:, :, kk].T for kk in range(3)], axis=0)
    bf16, f32 = jnp.bfloat16, jnp.float32
    return {
        'wqkv': jnp.concatenate([wq, wk, wv], axis=1).astype(bf16),        # (D, 3D)
        'bqkv': jnp.concatenate([bq, bk, bv]).reshape(1, 3 * D).astype(f32),
        'wo': p['out_proj_w'].T.astype(bf16),
        'bo': p['out_proj_b'].reshape(1, D).astype(f32),
        'g1': p['norm1_g'].reshape(1, D).astype(f32),
        'be1': p['norm1_b'].reshape(1, D).astype(f32),
        'w1': p['lin1_w'].T.astype(bf16),
        'b1': p['lin1_b'].reshape(1, -1).astype(f32),
        'w2': p['lin2_w'].T.astype(bf16),
        'b2': p['lin2_b'].reshape(1, D).astype(f32),
        'g2': p['norm2_g'].reshape(1, D).astype(f32),
        'be2': p['norm2_b'].reshape(1, D).astype(f32),
        'wc': wc3.astype(bf16),                                            # (3D, D)
        'bc': p['conv_b'].reshape(1, D).astype(f32),
    }


# ----------------------------------------------------------------------------
# Wrapper
# ----------------------------------------------------------------------------
def conv_transformer_layer(x, p):
    S, N, E = x.shape
    D, H = E, p['num_heads']
    B = N
    assert D % H == 0
    assert S % 8 == 0, "sublane constraint: per-batch row block must be a multiple of 8"

    pp = _prep_params(p, D)
    x2d = jnp.transpose(x, (1, 0, 2)).reshape(B * S, D).astype(jnp.float32)

    def full(arr):  # whole array resident, revisited block (loaded once)
        return pl.BlockSpec(arr.shape, lambda b: (0,) * arr.ndim)

    cparams = pltpu.CompilerParams(
        dimension_semantics=("parallel",),      # batch blocks are independent
        vmem_limit_bytes=32 * 1024 * 1024,
    )

    # ---- pass 1: Transformer encoder layer, one batch block per grid step ----
    enc_args = (x2d, pp['wqkv'], pp['bqkv'], pp['wo'], pp['bo'], pp['g1'], pp['be1'],
                pp['w1'], pp['b1'], pp['w2'], pp['b2'], pp['g2'], pp['be2'])
    enc2d = pl.pallas_call(
        functools.partial(encoder_kernel, D=D, H=H),
        out_shape=jax.ShapeDtypeStruct((B * S, D), jnp.float32),
        grid=(B,),
        in_specs=[pl.BlockSpec((S, D), lambda b: (b, 0))]
                 + [full(a) for a in enc_args[1:]],
        out_specs=pl.BlockSpec((S, D), lambda b: (b, 0)),
        compiler_params=cparams,
    )(*enc_args)

    # Zero-pad one batch block on each side; the conv window slides over the N axis.
    enc_pad = jnp.pad(enc2d, ((S, S), (0, 0)))

    # ---- pass 2: k=3 'same' conv over N + ReLU; halo expressed via shifted BlockSpecs ----
    out2d = pl.pallas_call(
        conv_kernel,
        out_shape=jax.ShapeDtypeStruct((B * S, D), jnp.float32),
        grid=(B,),
        in_specs=[pl.BlockSpec((S, D), lambda b: (b, 0)),       # enc[b-1]
                  pl.BlockSpec((S, D), lambda b: (b + 1, 0)),   # enc[b]
                  pl.BlockSpec((S, D), lambda b: (b + 2, 0)),   # enc[b+1]
                  full(pp['wc']), full(pp['bc'])],
        out_specs=pl.BlockSpec((S, D), lambda b: (b, 0)),
        compiler_params=cparams,
    )(enc_pad, enc_pad, enc_pad, pp['wc'], pp['bc'])

    return jnp.transpose(out2d.reshape(B, S, D), (1, 0, 2))     # back to (S, N, E)


# ----------------------------------------------------------------------------
# References
# ----------------------------------------------------------------------------
def reference_policy(x, pp, H):
    """Pure-JAX mirror of the kernels' mixed-precision policy (bf16 matmul operands,
    f32 accumulation / LN / softmax).  Tight check of the kernel algebra."""
    S, N, D = x.shape
    Dh = D // H
    bf16, f32 = jnp.bfloat16, jnp.float32
    dot = lambda a, b: jnp.dot(a.astype(bf16), b.astype(bf16), preferred_element_type=f32)

    x2d = jnp.transpose(x, (1, 0, 2)).reshape(N * S, D).astype(f32)
    qkv = dot(x2d, pp['wqkv']) + pp['bqkv']
    q, k, v = qkv[:, :D], qkv[:, D:2 * D], qkv[:, 2 * D:]
    q = q.reshape(N, S, H, Dh).astype(bf16)
    k = k.reshape(N, S, H, Dh).astype(bf16)
    v = v.reshape(N, S, H, Dh).astype(bf16)
    s = jnp.einsum('bqhd,bkhd->bhqk', q, k, preferred_element_type=f32)
    pr = jax.nn.softmax(s, axis=-1)
    ctx = jnp.einsum('bhqk,bkhd->bqhd', pr.astype(bf16), v,
                     preferred_element_type=f32).reshape(N * S, D)
    attn = dot(ctx, pp['wo']) + pp['bo']
    x1 = _layer_norm(x2d + attn, pp['g1'], pp['be1'])
    h1 = jnp.maximum(dot(x1, pp['w1']) + pp['b1'], 0.0)
    h2 = dot(h1, pp['w2']) + pp['b2']
    enc = _layer_norm(x1 + h2, pp['g2'], pp['be2']).reshape(N, S, D)
    encp = jnp.pad(enc, ((1, 1), (0, 0), (0, 0)))
    cat = jnp.concatenate([encp[:-2], encp[1:-1], encp[2:]], axis=-1)       # (N, S, 3D)
    y = jnp.einsum('nsc,cd->nsd', cat.astype(bf16), pp['wc'],
                   preferred_element_type=f32) + pp['bc']
    return jnp.transpose(jnp.maximum(y, 0.0), (1, 0, 2))


def reference_f32(x, p):
    """Full-f32 (HIGHEST precision) mirror of the PyTorch eval-mode forward."""
    S, N, E = x.shape
    D, H = E, p['num_heads']
    Dh = D // H
    Wq, Wk, Wv = p['in_proj_w'][:D], p['in_proj_w'][D:2 * D], p['in_proj_w'][2 * D:]
    bq, bk, bv = p['in_proj_b'][:D], p['in_proj_b'][D:2 * D], p['in_proj_b'][2 * D:]

    q = (jnp.einsum('snd,ed->sne', x, Wq, precision=HP) + bq).reshape(S, N, H, Dh)
    k = (jnp.einsum('snd,ed->sne', x, Wk, precision=HP) + bk).reshape(S, N, H, Dh)
    v = (jnp.einsum('snd,ed->sne', x, Wv, precision=HP) + bv).reshape(S, N, H, Dh)
    s = jnp.einsum('snhd,tnhd->nhst', q, k, precision=HP) / (Dh ** 0.5)
    a = jax.nn.softmax(s, axis=-1)
    o = jnp.einsum('nhst,tnhd->snhd', a, v, precision=HP).reshape(S, N, D)
    attn = jnp.einsum('snd,ed->sne', o, p['out_proj_w'], precision=HP) + p['out_proj_b']

    x1 = _layer_norm(x + attn, p['norm1_g'], p['norm1_b'])
    h1 = jnp.maximum(jnp.einsum('snd,fd->snf', x1, p['lin1_w'], precision=HP) + p['lin1_b'], 0.0)
    h2 = jnp.einsum('snf,df->snd', h1, p['lin2_w'], precision=HP) + p['lin2_b']
    enc = _layer_norm(x1 + h2, p['norm2_g'], p['norm2_b'])

    enc_pad = jnp.pad(enc, ((0, 0), (1, 1), (0, 0)))
    y = sum(jnp.einsum('snc,oc->sno', enc_pad[:, kk:kk + N, :], p['conv_w'][:, :, kk],
                       precision=HP) for kk in range(3))
    return jnp.maximum(y + p['conv_b'], 0.0)


if __name__ == "__main__":
    key = jax.random.PRNGKey(0)
    kx, kp = jax.random.split(key)
    d_model, dff, num_heads = 32, 64, 4
    S, N = 8, 2                                   # (seq, batch), batch_first=False
    x = jax.random.normal(kx, (S, N, d_model), jnp.float32)
    params = init_params(kp, d_model, dff, num_heads)

    out = jax.block_until_ready(conv_transformer_layer(x, params))

    # Tight check: same bf16-operand / f32-accumulate policy as the kernels.
    pp = _prep_params(params, d_model)
    ref_pol = jax.block_until_ready(reference_policy(x, pp, num_heads))
    np.testing.assert_allclose(np.asarray(out), np.asarray(ref_pol), rtol=5e-3, atol=5e-3)

    # Sanity check vs the full-f32 PyTorch-equivalent forward (bf16 matmul operands
    # bound the gap well within this tolerance).
    ref_f32 = jax.block_until_ready(reference_f32(x, params))
    np.testing.assert_allclose(np.asarray(out), np.asarray(ref_f32), rtol=2e-2, atol=2e-2)

    print("KERNEL_OK")
</pallas_src>

<mosaic_0001>
module attributes {stable_mosaic.version = 11 : i64} {
  func.func @encoder_kernel(%arg0: i32, %arg1: memref<8x32xf32, #tpu.memory_space<vmem>>, %arg2: memref<32x96xbf16, #tpu.memory_space<vmem>>, %arg3: memref<1x96xf32, #tpu.memory_space<vmem>>, %arg4: memref<32x32xbf16, #tpu.memory_space<vmem>>, %arg5: memref<1x32xf32, #tpu.memory_space<vmem>>, %arg6: memref<1x32xf32, #tpu.memory_space<vmem>>, %arg7: memref<1x32xf32, #tpu.memory_space<vmem>>, %arg8: memref<32x64xbf16, #tpu.memory_space<vmem>>, %arg9: memref<1x64xf32, #tpu.memory_space<vmem>>, %arg10: memref<64x32xbf16, #tpu.memory_space<vmem>>, %arg11: memref<1x32xf32, #tpu.memory_space<vmem>>, %arg12: memref<1x32xf32, #tpu.memory_space<vmem>>, %arg13: memref<1x32xf32, #tpu.memory_space<vmem>>, %arg14: memref<8x32xf32, #tpu.memory_space<vmem>>) attributes {dimension_semantics = [#tpu.dimension_semantics<parallel>], iteration_bounds = array<i64: 2>, scalar_prefetch = 0 : i64, scratch_operands = 0 : i64, tpu.core_type = #tpu.core_type<tc>, window_params = [{transform_indices = @transform_0, window_bounds = array<i64: 8, 32>}, {pipeline_mode = #tpu.pipeline_mode<synchronous>, transform_indices = @transform_1, window_bounds = array<i64: 32, 96>}, {pipeline_mode = #tpu.pipeline_mode<synchronous>, transform_indices = @transform_2, window_bounds = array<i64: 1, 96>}, {pipeline_mode = #tpu.pipeline_mode<synchronous>, transform_indices = @transform_3, window_bounds = array<i64: 32, 32>}, {pipeline_mode = #tpu.pipeline_mode<synchronous>, transform_indices = @transform_4, window_bounds = array<i64: 1, 32>}, {pipeline_mode = #tpu.pipeline_mode<synchronous>, transform_indices = @transform_5, window_bounds = array<i64: 1, 32>}, {pipeline_mode = #tpu.pipeline_mode<synchronous>, transform_indices = @transform_6, window_bounds = array<i64: 1, 32>}, {pipeline_mode = #tpu.pipeline_mode<synchronous>, transform_indices = @transform_7, window_bounds = array<i64: 32, 64>}, {pipeline_mode = #tpu.pipeline_mode<synchronous>, transform_indices = @transform_8, window_bounds = array<i64: 1, 64>}, {pipeline_mode = #tpu.pipeline_mode<synchronous>, transform_indices = @transform_9, window_bounds = array<i64: 64, 32>}, {pipeline_mode = #tpu.pipeline_mode<synchronous>, transform_indices = @transform_10, window_bounds = array<i64: 1, 32>}, {pipeline_mode = #tpu.pipeline_mode<synchronous>, transform_indices = @transform_11, window_bounds = array<i64: 1, 32>}, {pipeline_mode = #tpu.pipeline_mode<synchronous>, transform_indices = @transform_12, window_bounds = array<i64: 1, 32>}, {transform_indices = @transform_13, window_bounds = array<i64: 8, 32>}]} {
    %c0 = arith.constant 0 : index
    %c0_0 = arith.constant 0 : index
    %0 = vector.load %arg1[%c0, %c0_0] : memref<8x32xf32, #tpu.memory_space<vmem>>, vector<8x32xf32>
    %c0_1 = arith.constant 0 : index
    %c0_2 = arith.constant 0 : index
    %1 = vector.load %arg2[%c0_1, %c0_2] : memref<32x96xbf16, #tpu.memory_space<vmem>>, vector<32x96xbf16>
    %2 = arith.truncf %0 : vector<8x32xf32> to vector<8x32xbf16>
    %cst = arith.constant dense<0.000000e+00> : vector<8x96xf32>
    %3 = tpu.matmul %2, %1, %cst {dimension_numbers = #tpu.dot_dimension_numbers<[1], [0], [0], [1], [0, 0, 1, 1], [], []>} : vector<8x32xbf16>, vector<32x96xbf16>, vector<8x96xf32> -> vector<8x96xf32>
    %c0_3 = arith.constant 0 : index
    %c0_4 = arith.constant 0 : index
    %4 = vector.load %arg3[%c0_3, %c0_4] : memref<1x96xf32, #tpu.memory_space<vmem>>, vector<1x96xf32>
    %5 = vector.broadcast %4 : vector<1x96xf32> to vector<8x96xf32>
    %6 = arith.addf %3, %5 : vector<8x96xf32>
    %7 = vector.extract_strided_slice %6 {offsets = [0, 0], sizes = [8, 32], strides = [1, 1]} : vector<8x96xf32> to vector<8x32xf32>
    %8 = vector.extract_strided_slice %6 {offsets = [0, 32], sizes = [8, 32], strides = [1, 1]} : vector<8x96xf32> to vector<8x32xf32>
    %9 = vector.extract_strided_slice %6 {offsets = [0, 64], sizes = [8, 32], strides = [1, 1]} : vector<8x96xf32> to vector<8x32xf32>
    %10 = vector.extract_strided_slice %7 {offsets = [0, 0], sizes = [8, 8], strides = [1, 1]} : vector<8x32xf32> to vector<8x8xf32>
    %11 = arith.truncf %10 : vector<8x8xf32> to vector<8x8xbf16>
    %12 = vector.extract_strided_slice %8 {offsets = [0, 0], sizes = [8, 8], strides = [1, 1]} : vector<8x32xf32> to vector<8x8xf32>
    %13 = arith.truncf %12 : vector<8x8xf32> to vector<8x8xbf16>
    %cst_5 = arith.constant dense<0.000000e+00> : vector<8x8xf32>
    %14 = tpu.matmul %11, %13, %cst_5 {dimension_numbers = #tpu.dot_dimension_numbers<[1], [1], [0], [0], [0, 0, 1, 0], [], []>} : vector<8x8xbf16>, vector<8x8xbf16>, vector<8x8xf32> -> vector<8x8xf32>
    %cst_6 = arith.constant dense<0xFF800000> : vector<8xf32>
    %15 = vector.multi_reduction <maximumf>, %14, %cst_6 [1] : vector<8x8xf32> to vector<8xf32>
    %16 = vector.shape_cast %15 : vector<8xf32> to vector<8x1xf32>
    %17 = vector.broadcast %16 : vector<8x1xf32> to vector<8x8xf32>
    %18 = arith.subf %14, %17 : vector<8x8xf32>
    %19 = math.exp %18 : vector<8x8xf32>
    %cst_7 = arith.constant dense<0.000000e+00> : vector<8xf32>
    %20 = vector.multi_reduction <add>, %19, %cst_7 [1] : vector<8x8xf32> to vector<8xf32>
    %21 = vector.shape_cast %20 : vector<8xf32> to vector<8x1xf32>
    %22 = tpu.reciprocal %21 {approx = true} : vector<8x1xf32> -> vector<8x1xf32>
    %23 = vector.broadcast %22 : vector<8x1xf32> to vector<8x8xf32>
    %24 = arith.mulf %19, %23 : vector<8x8xf32>
    %25 = vector.extract_strided_slice %9 {offsets = [0, 0], sizes = [8, 8], strides = [1, 1]} : vector<8x32xf32> to vector<8x8xf32>
    %26 = arith.truncf %24 : vector<8x8xf32> to vector<8x8xbf16>
    %27 = arith.truncf %25 : vector<8x8xf32> to vector<8x8xbf16>
    %cst_8 = arith.constant dense<0.000000e+00> : vector<8x8xf32>
    %28 = tpu.matmul %26, %27, %cst_8 {dimension_numbers = #tpu.dot_dimension_numbers<[1], [0], [0], [1], [0, 0, 1, 1], [], []>} : vector<8x8xbf16>, vector<8x8xbf16>, vector<8x8xf32> -> vector<8x8xf32>
    %29 = vector.extract_strided_slice %7 {offsets = [0, 8], sizes = [8, 8], strides = [1, 1]} : vector<8x32xf32> to vector<8x8xf32>
    %30 = arith.truncf %29 : vector<8x8xf32> to vector<8x8xbf16>
    %31 = vector.extract_strided_slice %8 {offsets = [0, 8], sizes = [8, 8], strides = [1, 1]} : vector<8x32xf32> to vector<8x8xf32>
    %32 = arith.truncf %31 : vector<8x8xf32> to vector<8x8xbf16>
    %cst_9 = arith.constant dense<0.000000e+00> : vector<8x8xf32>
    %33 = tpu.matmul %30, %32, %cst_9 {dimension_numbers = #tpu.dot_dimension_numbers<[1], [1], [0], [0], [0, 0, 1, 0], [], []>} : vector<8x8xbf16>, vector<8x8xbf16>, vector<8x8xf32> -> vector<8x8xf32>
    %cst_10 = arith.constant dense<0xFF800000> : vector<8xf32>
    %34 = vector.multi_reduction <maximumf>, %33, %cst_10 [1] : vector<8x8xf32> to vector<8xf32>
    %35 = vector.shape_cast %34 : vector<8xf32> to vector<8x1xf32>
    %36 = vector.broadcast %35 : vector<8x1xf32> to vector<8x8xf32>
    %37 = arith.subf %33, %36 : vector<8x8xf32>
    %38 = math.exp %37 : vector<8x8xf32>
    %cst_11 = arith.constant dense<0.000000e+00> : vector<8xf32>
    %39 = vector.multi_reduction <add>, %38, %cst_11 [1] : vector<8x8xf32> to vector<8xf32>
    %40 = vector.shape_cast %39 : vector<8xf32> to vector<8x1xf32>
    %41 = tpu.reciprocal %40 {approx = true} : vector<8x1xf32> -> vector<8x1xf32>
    %42 = vector.broadcast %41 : vector<8x1xf32> to vector<8x8xf32>
    %43 = arith.mulf %38, %42 : vector<8x8xf32>
    %44 = vector.extract_strided_slice %9 {offsets = [0, 8], sizes = [8, 8], strides = [1, 1]} : vector<8x32xf32> to vector<8x8xf32>
    %45 = arith.truncf %43 : vector<8x8xf32> to vector<8x8xbf16>
    %46 = arith.truncf %44 : vector<8x8xf32> to vector<8x8xbf16>
    %cst_12 = arith.constant dense<0.000000e+00> : vector<8x8xf32>
    %47 = tpu.matmul %45, %46, %cst_12 {dimension_numbers = #tpu.dot_dimension_numbers<[1], [0], [0], [1], [0, 0, 1, 1], [], []>} : vector<8x8xbf16>, vector<8x8xbf16>, vector<8x8xf32> -> vector<8x8xf32>
    %48 = vector.extract_strided_slice %7 {offsets = [0, 16], sizes = [8, 8], strides = [1, 1]} : vector<8x32xf32> to vector<8x8xf32>
    %49 = arith.truncf %48 : vector<8x8xf32> to vector<8x8xbf16>
    %50 = vector.extract_strided_slice %8 {offsets = [0, 16], sizes = [8, 8], strides = [1, 1]} : vector<8x32xf32> to vector<8x8xf32>
    %51 = arith.truncf %50 : vector<8x8xf32> to vector<8x8xbf16>
    %cst_13 = arith.constant dense<0.000000e+00> : vector<8x8xf32>
    %52 = tpu.matmul %49, %51, %cst_13 {dimension_numbers = #tpu.dot_dimension_numbers<[1], [1], [0], [0], [0, 0, 1, 0], [], []>} : vector<8x8xbf16>, vector<8x8xbf16>, vector<8x8xf32> -> vector<8x8xf32>
    %cst_14 = arith.constant dense<0xFF800000> : vector<8xf32>
    %53 = vector.multi_reduction <maximumf>, %52, %cst_14 [1] : vector<8x8xf32> to vector<8xf32>
    %54 = vector.shape_cast %53 : vector<8xf32> to vector<8x1xf32>
    %55 = vector.broadcast %54 : vector<8x1xf32> to vector<8x8xf32>
    %56 = arith.subf %52, %55 : vector<8x8xf32>
    %57 = math.exp %56 : vector<8x8xf32>
    %cst_15 = arith.constant dense<0.000000e+00> : vector<8xf32>
    %58 = vector.multi_reduction <add>, %57, %cst_15 [1] : vector<8x8xf32> to vector<8xf32>
    %59 = vector.shape_cast %58 : vector<8xf32> to vector<8x1xf32>
    %60 = tpu.reciprocal %59 {approx = true} : vector<8x1xf32> -> vector<8x1xf32>
    %61 = vector.broadcast %60 : vector<8x1xf32> to vector<8x8xf32>
    %62 = arith.mulf %57, %61 : vector<8x8xf32>
    %63 = vector.extract_strided_slice %9 {offsets = [0, 16], sizes = [8, 8], strides = [1, 1]} : vector<8x32xf32> to vector<8x8xf32>
    %64 = arith.truncf %62 : vector<8x8xf32> to vector<8x8xbf16>
    %65 = arith.truncf %63 : vector<8x8xf32> to vector<8x8xbf16>
    %cst_16 = arith.constant dense<0.000000e+00> : vector<8x8xf32>
    %66 = tpu.matmul %64, %65, %cst_16 {dimension_numbers = #tpu.dot_dimension_numbers<[1], [0], [0], [1], [0, 0, 1, 1], [], []>} : vector<8x8xbf16>, vector<8x8xbf16>, vector<8x8xf32> -> vector<8x8xf32>
    %67 = vector.extract_strided_slice %7 {offsets = [0, 24], sizes = [8, 8], strides = [1, 1]} : vector<8x32xf32> to vector<8x8xf32>
    %68 = arith.truncf %67 : vector<8x8xf32> to vector<8x8xbf16>
    %69 = vector.extract_strided_slice %8 {offsets = [0, 24], sizes = [8, 8], strides = [1, 1]} : vector<8x32xf32> to vector<8x8xf32>
    %70 = arith.truncf %69 : vector<8x8xf32> to vector<8x8xbf16>
    %cst_17 = arith.constant dense<0.000000e+00> : vector<8x8xf32>
    %71 = tpu.matmul %68, %70, %cst_17 {dimension_numbers = #tpu.dot_dimension_numbers<[1], [1], [0], [0], [0, 0, 1, 0], [], []>} : vector<8x8xbf16>, vector<8x8xbf16>, vector<8x8xf32> -> vector<8x8xf32>
    %cst_18 = arith.constant dense<0xFF800000> : vector<8xf32>
    %72 = vector.multi_reduction <maximumf>, %71, %cst_18 [1] : vector<8x8xf32> to vector<8xf32>
    %73 = vector.shape_cast %72 : vector<8xf32> to vector<8x1xf32>
    %74 = vector.broadcast %73 : vector<8x1xf32> to vector<8x8xf32>
    %75 = arith.subf %71, %74 : vector<8x8xf32>
    %76 = math.exp %75 : vector<8x8xf32>
    %cst_19 = arith.constant dense<0.000000e+00> : vector<8xf32>
    %77 = vector.multi_reduction <add>, %76, %cst_19 [1] : vector<8x8xf32> to vector<8xf32>
    %78 = vector.shape_cast %77 : vector<8xf32> to vector<8x1xf32>
    %79 = tpu.reciprocal %78 {approx = true} : vector<8x1xf32> -> vector<8x1xf32>
    %80 = vector.broadcast %79 : vector<8x1xf32> to vector<8x8xf32>
    %81 = arith.mulf %76, %80 : vector<8x8xf32>
    %82 = vector.extract_strided_slice %9 {offsets = [0, 24], sizes = [8, 8], strides = [1, 1]} : vector<8x32xf32> to vector<8x8xf32>
    %83 = arith.truncf %81 : vector<8x8xf32> to vector<8x8xbf16>
    %84 = arith.truncf %82 : vector<8x8xf32> to vector<8x8xbf16>
    %cst_20 = arith.constant dense<0.000000e+00> : vector<8x8xf32>
    %85 = tpu.matmul %83, %84, %cst_20 {dimension_numbers = #tpu.dot_dimension_numbers<[1], [0], [0], [1], [0, 0, 1, 1], [], []>} : vector<8x8xbf16>, vector<8x8xbf16>, vector<8x8xf32> -> vector<8x8xf32>
    %86 = tpu.concatenate %28, %47, %66, %85 in 1 : vector<8x8xf32>, vector<8x8xf32>, vector<8x8xf32>, vector<8x8xf32> -> vector<8x32xf32>
    %c0_21 = arith.constant 0 : index
    %c0_22 = arith.constant 0 : index
    %87 = vector.load %arg4[%c0_21, %c0_22] : memref<32x32xbf16, #tpu.memory_space<vmem>>, vector<32x32xbf16>
    %88 = arith.truncf %86 : vector<8x32xf32> to vector<8x32xbf16>
    %cst_23 = arith.constant dense<0.000000e+00> : vector<8x32xf32>
    %89 = tpu.matmul %88, %87, %cst_23 {dimension_numbers = #tpu.dot_dimension_numbers<[1], [0], [0], [1], [0, 0, 1, 1], [], []>} : vector<8x32xbf16>, vector<32x32xbf16>, vector<8x32xf32> -> vector<8x32xf32>
    %c0_24 = arith.constant 0 : index
    %c0_25 = arith.constant 0 : index
    %90 = vector.load %arg5[%c0_24, %c0_25] : memref<1x32xf32, #tpu.memory_space<vmem>>, vector<1x32xf32>
    %91 = vector.broadcast %90 : vector<1x32xf32> to vector<8x32xf32>
    %92 = arith.addf %89, %91 : vector<8x32xf32>
    %93 = arith.addf %0, %92 : vector<8x32xf32>
    %c0_26 = arith.constant 0 : index
    %c0_27 = arith.constant 0 : index
    %94 = vector.load %arg6[%c0_26, %c0_27] : memref<1x32xf32, #tpu.memory_space<vmem>>, vector<1x32xf32>
    %c0_28 = arith.constant 0 : index
    %c0_29 = arith.constant 0 : index
    %95 = vector.load %arg7[%c0_28, %c0_29] : memref<1x32xf32, #tpu.memory_space<vmem>>, vector<1x32xf32>
    %cst_30 = arith.constant dense<0.000000e+00> : vector<8xf32>
    %96 = vector.multi_reduction <add>, %93, %cst_30 [1] : vector<8x32xf32> to vector<8xf32>
    %97 = vector.shape_cast %96 : vector<8xf32> to vector<8x1xf32>
    %cst_31 = arith.constant 3.200000e+01 : f32
    %98 = vector.broadcast %cst_31 : f32 to vector<8x1xf32>
    %99 = arith.divf %97, %98 : vector<8x1xf32>
    %100 = vector.broadcast %99 : vector<8x1xf32> to vector<8x32xf32>
    %101 = arith.subf %93, %100 : vector<8x32xf32>
    %102 = arith.mulf %101, %101 : vector<8x32xf32>
    %cst_32 = arith.constant dense<0.000000e+00> : vector<8xf32>
    %103 = vector.multi_reduction <add>, %102, %cst_32 [1] : vector<8x32xf32> to vector<8xf32>
    %104 = vector.shape_cast %103 : vector<8xf32> to vector<8x1xf32>
    %cst_33 = arith.constant 3.200000e+01 : f32
    %105 = vector.broadcast %cst_33 : f32 to vector<8x1xf32>
    %106 = arith.divf %104, %105 : vector<8x1xf32>
    %107 = vector.broadcast %99 : vector<8x1xf32> to vector<8x32xf32>
    %108 = arith.subf %93, %107 : vector<8x32xf32>
    %cst_34 = arith.constant 9.99999974E-6 : f32
    %109 = vector.broadcast %cst_34 : f32 to vector<8x1xf32>
    %110 = arith.addf %106, %109 : vector<8x1xf32>
    %111 = math.rsqrt %110 : vector<8x1xf32>
    %112 = vector.broadcast %111 : vector<8x1xf32> to vector<8x32xf32>
    %113 = arith.mulf %108, %112 : vector<8x32xf32>
    %114 = vector.broadcast %94 : vector<1x32xf32> to vector<8x32xf32>
    %115 = arith.mulf %113, %114 : vector<8x32xf32>
    %116 = vector.broadcast %95 : vector<1x32xf32> to vector<8x32xf32>
    %117 = arith.addf %115, %116 : vector<8x32xf32>
    %c0_35 = arith.constant 0 : index
    %c0_36 = arith.constant 0 : index
    %118 = vector.load %arg8[%c0_35, %c0_36] : memref<32x64xbf16, #tpu.memory_space<vmem>>, vector<32x64xbf16>
    %119 = arith.truncf %117 : vector<8x32xf32> to vector<8x32xbf16>
    %cst_37 = arith.constant dense<0.000000e+00> : vector<8x64xf32>
    %120 = tpu.matmul %119, %118, %cst_37 {dimension_numbers = #tpu.dot_dimension_numbers<[1], [0], [0], [1], [0, 0, 1, 1], [], []>} : vector<8x32xbf16>, vector<32x64xbf16>, vector<8x64xf32> -> vector<8x64xf32>
    %c0_38 = arith.constant 0 : index
    %c0_39 = arith.constant 0 : index
    %121 = vector.load %arg9[%c0_38, %c0_39] : memref<1x64xf32, #tpu.memory_space<vmem>>, vector<1x64xf32>
    %122 = vector.broadcast %121 : vector<1x64xf32> to vector<8x64xf32>
    %123 = arith.addf %120, %122 : vector<8x64xf32>
    %cst_40 = arith.constant 0.000000e+00 : f32
    %124 = vector.broadcast %cst_40 : f32 to vector<8x64xf32>
    %125 = arith.maximumf %123, %124 : vector<8x64xf32>
    %c0_41 = arith.constant 0 : index
    %c0_42 = arith.constant 0 : index
    %126 = vector.load %arg10[%c0_41, %c0_42] : memref<64x32xbf16, #tpu.memory_space<vmem>>, vector<64x32xbf16>
    %127 = arith.truncf %125 : vector<8x64xf32> to vector<8x64xbf16>
    %cst_43 = arith.constant dense<0.000000e+00> : vector<8x32xf32>
    %128 = tpu.matmul %127, %126, %cst_43 {dimension_numbers = #tpu.dot_dimension_numbers<[1], [0], [0], [1], [0, 0, 1, 1], [], []>} : vector<8x64xbf16>, vector<64x32xbf16>, vector<8x32xf32> -> vector<8x32xf32>
    %c0_44 = arith.constant 0 : index
    %c0_45 = arith.constant 0 : index
    %129 = vector.load %arg11[%c0_44, %c0_45] : memref<1x32xf32, #tpu.memory_space<vmem>>, vector<1x32xf32>
    %130 = vector.broadcast %129 : vector<1x32xf32> to vector<8x32xf32>
    %131 = arith.addf %128, %130 : vector<8x32xf32>
    %132 = arith.addf %117, %131 : vector<8x32xf32>
    %c0_46 = arith.constant 0 : index
    %c0_47 = arith.constant 0 : index
    %133 = vector.load %arg12[%c0_46, %c0_47] : memref<1x32xf32, #tpu.memory_space<vmem>>, vector<1x32xf32>
    %c0_48 = arith.constant 0 : index
    %c0_49 = arith.constant 0 : index
    %134 = vector.load %arg13[%c0_48, %c0_49] : memref<1x32xf32, #tpu.memory_space<vmem>>, vector<1x32xf32>
    %cst_50 = arith.constant dense<0.000000e+00> : vector<8xf32>
    %135 = vector.multi_reduction <add>, %132, %cst_50 [1] : vector<8x32xf32> to vector<8xf32>
    %136 = vector.shape_cast %135 : vector<8xf32> to vector<8x1xf32>
    %cst_51 = arith.constant 3.200000e+01 : f32
    %137 = vector.broadcast %cst_51 : f32 to vector<8x1xf32>
    %138 = arith.divf %136, %137 : vector<8x1xf32>
    %139 = vector.broadcast %138 : vector<8x1xf32> to vector<8x32xf32>
    %140 = arith.subf %132, %139 : vector<8x32xf32>
    %141 = arith.mulf %140, %140 : vector<8x32xf32>
    %cst_52 = arith.constant dense<0.000000e+00> : vector<8xf32>
    %142 = vector.multi_reduction <add>, %141, %cst_52 [1] : vector<8x32xf32> to vector<8xf32>
    %143 = vector.shape_cast %142 : vector<8xf32> to vector<8x1xf32>
    %cst_53 = arith.constant 3.200000e+01 : f32
    %144 = vector.broadcast %cst_53 : f32 to vector<8x1xf32>
    %145 = arith.divf %143, %144 : vector<8x1xf32>
    %146 = vector.broadcast %138 : vector<8x1xf32> to vector<8x32xf32>
    %147 = arith.subf %132, %146 : vector<8x32xf32>
    %cst_54 = arith.constant 9.99999974E-6 : f32
    %148 = vector.broadcast %cst_54 : f32 to vector<8x1xf32>
    %149 = arith.addf %145, %148 : vector<8x1xf32>
    %150 = math.rsqrt %149 : vector<8x1xf32>
    %151 = vector.broadcast %150 : vector<8x1xf32> to vector<8x32xf32>
    %152 = arith.mulf %147, %151 : vector<8x32xf32>
    %153 = vector.broadcast %133 : vector<1x32xf32> to vector<8x32xf32>
    %154 = arith.mulf %152, %153 : vector<8x32xf32>
    %155 = vector.broadcast %134 : vector<1x32xf32> to vector<8x32xf32>
    %156 = arith.addf %154, %155 : vector<8x32xf32>
    %c0_55 = arith.constant 0 : index
    %c0_56 = arith.constant 0 : index
    %157 = vector.load %arg14[%c0_55, %c0_56] : memref<8x32xf32, #tpu.memory_space<vmem>>, vector<8x32xf32>
    tpu.vector_store %arg14[%c0_55, %c0_56], %156 {strides = array<i32>} : memref<8x32xf32, #tpu.memory_space<vmem>>, vector<8x32xf32>,
    return
  }
  func.func @transform_0(%arg0: i32) -> (i32, i32) {
    %c0_i32 = arith.constant 0 : i32
    %c0_i32_0 = arith.constant 0 : i32
    return %arg0, %c0_i32 : i32, i32
  }
  func.func @transform_1(%arg0: i32) -> (i32, i32) {
    %c0_i32 = arith.constant 0 : i32
    %c0_i32_0 = arith.constant 0 : i32
    %c0_i32_1 = arith.constant 0 : i32
    return %c0_i32, %c0_i32_0 : i32, i32
  }
  func.func @transform_2(%arg0: i32) -> (i32, i32) {
    %c0_i32 = arith.constant 0 : i32
    %c0_i32_0 = arith.constant 0 : i32
    %c0_i32_1 = arith.constant 0 : i32
    return %c0_i32, %c0_i32_0 : i32, i32
  }
  func.func @transform_3(%arg0: i32) -> (i32, i32) {
    %c0_i32 = arith.constant 0 : i32
    %c0_i32_0 = arith.constant 0 : i32
    %c0_i32_1 = arith.constant 0 : i32
    return %c0_i32, %c0_i32_0 : i32, i32
  }
  func.func @transform_4(%arg0: i32) -> (i32, i32) {
    %c0_i32 = arith.constant 0 : i32
    %c0_i32_0 = arith.constant 0 : i32
    %c0_i32_1 = arith.constant 0 : i32
    return %c0_i32, %c0_i32_0 : i32, i32
  }
  func.func @transform_5(%arg0: i32) -> (i32, i32) {
    %c0_i32 = arith.constant 0 : i32
    %c0_i32_0 = arith.constant 0 : i32
    %c0_i32_1 = arith.constant 0 : i32
    return %c0_i32, %c0_i32_0 : i32, i32
  }
  func.func @transform_6(%arg0: i32) -> (i32, i32) {
    %c0_i32 = arith.constant 0 : i32
    %c0_i32_0 = arith.constant 0 : i32
    %c0_i32_1 = arith.constant 0 : i32
    return %c0_i32, %c0_i32_0 : i32, i32
  }
  func.func @transform_7(%arg0: i32) -> (i32, i32) {
    %c0_i32 = arith.constant 0 : i32
    %c0_i32_0 = arith.constant 0 : i32
    %c0_i32_1 = arith.constant 0 : i32
    return %c0_i32, %c0_i32_0 : i32, i32
  }
  func.func @transform_8(%arg0: i32) -> (i32, i32) {
    %c0_i32 = arith.constant 0 : i32
    %c0_i32_0 = arith.constant 0 : i32
    %c0_i32_1 = arith.constant 0 : i32
    return %c0_i32, %c0_i32_0 : i32, i32
  }
  func.func @transform_9(%arg0: i32) -> (i32, i32) {
    %c0_i32 = arith.constant 0 : i32
    %c0_i32_0 = arith.constant 0 : i32
    %c0_i32_1 = arith.constant 0 : i32
    return %c0_i32, %c0_i32_0 : i32, i32
  }
  func.func @transform_10(%arg0: i32) -> (i32, i32) {
    %c0_i32 = arith.constant 0 : i32
    %c0_i32_0 = arith.constant 0 : i32
    %c0_i32_1 = arith.constant 0 : i32
    return %c0_i32, %c0_i32_0 : i32, i32
  }
  func.func @transform_11(%arg0: i32) -> (i32, i32) {
    %c0_i32 = arith.constant 0 : i32
    %c0_i32_0 = arith.constant 0 : i32
    %c0_i32_1 = arith.constant 0 : i32
    return %c0_i32, %c0_i32_0 : i32, i32
  }
  func.func @transform_12(%arg0: i32) -> (i32, i32) {
    %c0_i32 = arith.constant 0 : i32
    %c0_i32_0 = arith.constant 0 : i32
    %c0_i32_1 = arith.constant 0 : i32
    return %c0_i32, %c0_i32_0 : i32, i32
  }
  func.func @transform_13(%arg0: i32) -> (i32, i32) {
    %c0_i32 = arith.constant 0 : i32
    %c0_i32_0 = arith.constant 0 : i32
    return %arg0, %c0_i32 : i32, i32
  }
}

</mosaic_0001>

<bundles_post_ra>
// kernel: tpu_custom_call.1
= control target key start
LH: loop header
LB: loop body
LE: loop exit
PB: predicated region body
PF: predicated region fallthrough
CT: control target
= control target key end

     0   :  { %s1578_s0 = inlined_call_operand.vmem [shape: f32[16,32], index: 0, kind: input, shape index: {}]   ;;  %s1579_s1 = inlined_call_operand.vmem [shape: bf16[32,96], index: 1, kind: input, shape index: {}]   ;;  %s1580_s2 = inlined_call_operand.vmem [shape: f32[1,96], index: 2, kind: input, shape index: {}]   ;;  %s1581_s3 = inlined_call_operand.vmem [shape: bf16[32,32], index: 3, kind: input, shape index: {}]   ;;  %s1582_s4 = inlined_call_operand.vmem [shape: f32[1,32], index: 4, kind: input, shape index: {}]   ;;  %s1583_s5 = inlined_call_operand.vmem [shape: f32[1,32], index: 5, kind: input, shape index: {}]   ;;  %s1584_s6 = inlined_call_operand.vmem [shape: f32[1,32], index: 6, kind: input, shape index: {}]   ;;  %s1585_s7 = inlined_call_operand.hbm [shape: bf16[32,64], index: 7, kind: input, shape index: {}]   ;;  %s1586_s8 = inlined_call_operand.vmem [shape: f32[1,64], index: 8, kind: input, shape index: {}]   ;;  %s1587_s9 = inlined_call_operand.vmem [shape: bf16[64,32], index: 9, kind: input, shape index: {}]   ;;  %s1588_s10 = inlined_call_operand.vmem [shape: f32[1,32], index: 10, kind: input, shape index: {}]   ;;  %s1589_s11 = inlined_call_operand.vmem [shape: f32[1,32], index: 11, kind: input, shape index: {}]   ;;  %s1590_s12 = inlined_call_operand.vmem [shape: f32[1,32], index: 12, kind: input, shape index: {}]   ;;  %s1591_s13 = inlined_call_operand.hbm [shape: f32[16,32], index: 13, kind: output, shape index: {}]  }
   0x1   :  { %1593 = sst [smem:[#allocation10_spill]] %s1578_s0 }
   0x2   :  { %1594 = sst [smem:[#allocation11_spill]] %s1585_s7 }
   0x3   :  { %18 = vsyncpa [#allocation3], 0 }
   0x4   :  { %19 = vsyncpa [#allocation4], 0 }
   0x5   :  { %21 = vsyncpa [#allocation4 + $0x1], 0  ;;  %s1383_s25 = smov 0   ;;  %s1385_s26 = smov 0  }
   0x6   :  { %s1387_s27 = smov 0   ;;  %s1389_s28 = smov 0  }
   0x7 LB: > { %1595 = sst [smem:[#allocation8_spill]] %s1289_s27  ;;  %s1404_s29 = sadd.s32 4294967295, %s1293_s28   ;;  %s1293_s28 = sphi %s1389_s28, %s1605_s28   ;;  %s1289_s27 = sphi %s1387_s27, %s1602_s27   ;;  %s1285_s26 = sphi %s1385_s26, %s1604_s26   ;;  %s1281_s25 = sphi %s1383_s25, %s1603_s25  }
   0x8   : > { %s1026_s30 = sadd.s32 4294967294, %s1293_s28   ;;  %s1408_s14 = sadd.s32 1, %s1293_s28  }
   0x9   : > { %s312_s15 = sadd.s32 1, %s1289_s27  ;;  %s309_s16 = ssub.s32 %s1293_s28, %s1408_s14 }
   0xa   : > { %p322_p0 = scmp.ne.s32.totalorder %s1289_s27, %s1285_s26  ;;  %p310_p1 = scmp.eq.s32.totalorder %s309_s16, 0 }
   0xb   : > { %p323_p2 = scmp.eq.s32.totalorder %s1404_s29, 1  ;;  %p328_p3 = scmp.ne.s32.totalorder %s1285_s26, %s1281_s25 }
   0xc   : > { %p329_p4 = scmp.eq.s32.totalorder %s1026_s30, 1  ;;  %p1027_p7 = scmp.ge.s32.totalorder %s1293_s28, 1 }
   0xd   : > { %s1419_s17 = scalar_select %p310_p1, %s1289_s27, %s312_s15  }
   0xe   : > { %p1421_p5 = por %p323_p2, %p322_p0  ;;  %p1425_p6 = por %p329_p4, %p328_p3 }
   0xf   : > { %1596 = sst [smem:[#allocation9_spill]] %s1419_s17  ;;  %p336_p8 = scmp.lt.s32.totalorder %s1293_s28, 3 }
  0x10   : > { %p1114_p9 = scmp.eq.s32.totalorder %s1404_s29, 0  ;;  %s1599_s7 = sld [smem:[#allocation11_spill]] }
  0x11   : > { %p337_p10 = pnand %p1027_p7, %p336_p8  ;;  %s1295_s23 = smov [#allocation2]  }
  0x12   : > { %s367_s24 = sshll.u32 %s1295_s23, 4  ;;  %s1296_s30 = smov 64   ;;  %s368_s24 = int_to_ptr.vmem [resolvable:$true] %s367_s24 }
  0x13   : > { %p1106_p11 = pneg %p337_p10  ;;  %s1297_s15 = smov 4  }
  0x14   : > { %405 = sbr.rel (%p337_p10) target bundleno = 1907 (0x773), region = 72 }
  0x15   : > { %p1107_p12 = pnand %p1114_p9, %p1106_p11 }
  0x16   : > { %s365_s22 = sshll.u32 %s1599_s7, 4  ;;  %s366_s22 = int_to_ptr.hbm [resolvable:$true] %s365_s22 }
  0x17   : > { %1109 = dma.hbm_to_vmem [thread:$0]  (!%p1107_p12), %s366_s22, 256, %s368_s24, [#allocation3], %s1296_s30, %s1296_s30, %s1297_s15  }
  0x19   : > { %1272 = dma.done.wait (%p1114_p9), [#allocation3], 256  }
  0x1a   : > { %1274 = vsyncadd (%p1114_p9), [#allocation3], 4294967040  ;;  %p449_p13 = scmp.lt.s32.totalorder %s1404_s29, 1  ;;  %s1600_s0 = sld [smem:[#allocation10_spill]]  ;;  %v1091_v0 = vld [vmem:[%s1579_s1 + $0x8] sm:$0xff]  ;;  %v1090_v1 = vld [vmem:[%s1579_s1] sm:$0xff] }
  0x1b   : > { %486 = vmatpush.bf16.msra.mxu0 %v1091_v0  ;;  %vm476_vm0 = vcmask 261120   ;;  %v1167_v4 = vld [vmem:[%s1580_s2] ss:$0 sm:$0xff]  ;;  %s1298_s27 = smov 104   ;;  %s1300_s17 = smov 96   ;;  %vm497_vm1 = vcmask 64512  }
  0x1c   : > { %s450_s16 = scalar_select %p449_p13, %s1404_s29, 1  ;;  %vm534_vm2 = vcmask 1043456   ;;  %vm732_vm3 = vcmask 130048   ;;  %vm734_vm4 = vcmask 195584   ;;  %vm888_vm9 = vcmask 523264  }
  0x1d   : > { %s1303_s21 = smov 88   ;;  %s1304_s23 = smov 112  }
  0x1e   : > { %s1033_s20 = sshll.u32 %s450_s16, 3  ;;  %s1301_s16 = smov 80  }
  0x1f   : > { %487 = vmatpush.bf16.msra.mxu0 %v1090_v1  ;;  %s1305_s22 = smov 64   ;;  %s1306_s24 = smov 40  }
  0x20   : > { %s452_s7 = scalar_lea.vmem %s1600_s0, %s1033_s20  ;;  %s1302_s20 = smov 72  }
  0x21   : > { %v1452_v2 = vld [vmem:[%s452_s7] sm:$0xff]  ;;  %s1299_s7 = smov 120   ;;  %s1307_s30 = smov 56  }
  0x22   : > { %v459_v3 = vpack.c.bf16 %v1452_v2, %v1452_v2  ;;  %s1308_s15 = smov 48  }
  0x24   : > { %1042 = vmatmul.msk.bf16.vlgmr.msra.gmra.mxu0 %vm476_vm0, %v459_v3 }
  0xa1   : > { %v489_v5 = vpop.f32.mrf.mxu0 }
  0xa2   : > { %v490_v6 = vadd.f32 %v1167_v4, %v489_v5 }
  0xa4   : > { %v1460_v7 = vpack.c.bf16 %v490_v6, %v490_v6 }
  0xa6   : > { %663 = vrot.lane.b32.xlu2 %v1460_v7, %s1298_s27  ;;  %551 = vrot.lane.b32.xlu1 %v1460_v7, %s1299_s7  ;;  %s1309_s27 = smov 8   ;;  %s1310_s7 = smov 16  }
  0xa7   : > { %495 = vrot.lane.b32.xlu0 %v1460_v7, %s1300_s17  ;;  %s1311_s17 = smov 24  }
  0xa9   : > { %v491_v8 = vpop.f32.mrf.mxu0 }
  0xae   : > { %609 = vrot.lane.b32.xlu2 %v1460_v7, %s1301_s16  ;;  %665 = vrot.lane.b32.xlu1 %v1460_v7, %s1302_s20  ;;  %s446_s16 = sand.u32 1, %s1285_s26  }
  0xaf   : > { %553 = vrot.lane.b32.xlu0 %v1460_v7, %s1303_s21  ;;  %s1032_s20 = sshll.u32 %s446_s16, 3  ;;  %s1087_s21 = sshll.u32 %s1404_s29, 3 }
  0xb7   : > { %607 = vrot.lane.b32.xlu0 %v1460_v7, %s1304_s23  ;;  %s940_s23 = scalar_lea.sflag [#allocation4], %s446_s16 }
 0x100   : > { %v664_v9 = vpop.permute.xlu2 %663 }
 0x108   : > { %v610_v10 = vpop.permute.xlu2 %609 }
 0x109   : > { %v615_v11 = vsel %vm497_vm1, %v610_v10, 0 }
 0x10a   : > { %624 = vmatpush.bf16.xpose.msrb.mxu0 %v615_v11 }
 0x118   : > { %v552_v12 = vpop.permute.xlu1 %551 }
 0x119   : > { %v496_v13 = vpop.permute.xlu0 %495 }
 0x11a   : > { %v502_v14 = vsel %vm497_vm1, %v496_v13, 0 }
 0x11b   : > { %511 = vmatpush.bf16.xpose.msra.mxu1 %v502_v14 }
 0x120   : > { %v666_v15 = vpop.permute.xlu1 %665 }
 0x121   : > { %v554_v16 = vpop.permute.xlu0 %553  ;;  %v671_v17 = vsel %vm497_vm1, %v666_v15, 0 }
 0x122   : > { %1043 = vmatmul.msk.bf16.vlgmr.msra.gmra.mxu1 %vm497_vm1, %v1460_v7  ;;  %v559_v18 = vsel %vm497_vm1, %v554_v16, 0 }
 0x123   : > { %568 = vmatpush.bf16.xpose.msra.mxu3 %v559_v18 }
 0x129   : > { %v608_v19 = vpop.permute.xlu0 %607 }
 0x12a   : > { %1045 = vmatmul.msk.bf16.vlgmr.msra.gmra.mxu3 %vm497_vm1, %v552_v12  ;;  %1047 = vmatmul.msk.bf16.vlgmr.msrb.gmra.mxu0 %vm497_vm1, %v608_v19 }
 0x12b   : > { %680 = vmatpush.bf16.xpose.msrb.mxu3 %v671_v17 }
 0x13a   : > { %1049 = vmatmul.msk.bf16.vlgmr.msrb.gmra.mxu3 %vm497_vm1, %v664_v9 }
 0x19f   : > { %v513_v20 = vpop.f32.mrf.mxu1 }
 0x1a0   : > { %v517_v21 = vsel %vm497_vm1, %v513_v20, -inf }
 0x1a1   : > { %518 = vmax.xlane.f32.xlu1 %v517_v21  ;;  %v1093_v21 = vld [vmem:[%s1581_s3 + $0x8] sm:$0xff] }
 0x1a2   : > { %766 = vmatpush.bf16.msra.mxu0 %v1093_v21 }
 0x1a7   : > { %v515_v22 = vpop.f32.mrf.mxu1  ;;  %v626_v23 = vpop.f32.mrf.mxu0 }
 0x1a8   : > { %v630_v28 = vsel %vm497_vm1, %v626_v23, -inf  ;;  %v1092_v22 = vld [vmem:[%s1581_s3] sm:$0xff] }
 0x1a9   : > { %767 = vmatpush.bf16.msra.mxu0 %v1092_v22 }
 0x1ad   : > { %v570_v24 = vpop.f32.mrf.mxu3 }
 0x1ae   : > { %v574_v25 = vsel %vm497_vm1, %v570_v24, -inf }
 0x1af   : > { %575 = vmax.xlane.f32.xlu2 %v574_v25  ;;  %v628_v26 = vpop.f32.mrf.mxu0 }
 0x1b5   : > { %v572_v27 = vpop.f32.mrf.mxu3 }
 0x1b7   : > { %631 = vmax.xlane.f32.xlu2 %v630_v28 }
 0x1bd   : > { %v682_v29 = vpop.f32.mrf.mxu3 }
 0x1be   : > { %v686_v30 = vsel %vm497_vm1, %v682_v29, -inf }
 0x1bf   : > { %687 = vmax.xlane.f32.xlu0 %v686_v30  ;;  %v1168_v30 = vld [vmem:[%s1582_s4] ss:$0 sm:$0xff] }
 0x1c5   : > { %v684_v31 = vpop.f32.mrf.mxu3 }
 0x1cf   : > { %529 = vrot.lane.b32.xlu2 %v1460_v7, %s1305_s22 }
 0x1d7   : > { %698 = vrot.lane.b32.xlu2 %v1460_v7, %s1306_s24 }
 0x214   : > { %v519_v32 = vpop.xlane.xlu1 %518 }
 0x215   : > { %v520_v33 = vsub.f32 %v513_v20, %v519_v32 }
 0x217   : > { %v521_v34 = vmul.f32 1.442695, %v520_v33 }
 0x219   : > { %1175 = vpow2.f32 %v521_v34 }
 0x21f   : > { %v1176_v35 = vpop.eup %1175 }
 0x220   : > { %v523_v36 = vsel %vm497_vm1, %v1176_v35, 0.0 }
 0x221   : > { %524 = vadd.xlane.f32.xlu1 %v523_v36  ;;  %v1312_v36 = vmov 32.0  }
 0x222   : > { %v576_v37 = vpop.xlane.xlu2 %575 }
 0x223   : > { %v577_v40 = vsub.f32 %v570_v24, %v576_v37 }
 0x225   : > { %v578_v42 = vmul.f32 1.442695, %v577_v40 }
 0x22a   : > { %v632_v38 = vpop.xlane.xlu2 %631 }
 0x22b   : > { %v633_v39 = vsub.f32 %v626_v23, %v632_v38 }
 0x22d   : > { %v634_v41 = vmul.f32 1.442695, %v633_v39 }
 0x22f   : > { %1177 = vpow2.f32 %v634_v41 }
 0x230   : > { %1179 = vpow2.f32 %v578_v42 }
 0x232   : > { %v530_v43 = vpop.permute.xlu2 %529  ;;  %v688_v44 = vpop.xlane.xlu0 %687 }
 0x233   : > { %v536_v45 = vsel %vm534_vm2, %v530_v43, 0  ;;  %v689_v47 = vsub.f32 %v682_v29, %v688_v44 }
 0x234   : > { %545 = vmatpush.bf16.msra.mxu2 %v536_v45 }
 0x235   : > { %v1178_v46 = vpop.eup %1177  ;;  %v690_v49 = vmul.f32 1.442695, %v689_v47 }
 0x236   : > { %v636_v48 = vsel %vm497_vm1, %v1178_v46, 0.0  ;;  %v1180_v50 = vpop.eup %1179 }
 0x237   : > { %637 = vadd.xlane.f32.xlu0 %v636_v48  ;;  %1181 = vpow2.f32 %v690_v49  ;;  %v580_v51 = vsel %vm497_vm1, %v1180_v50, 0.0  ;;  %v1094_v48 = vld [vmem:[#allocation2] sm:$0xff]  ;;  %v1099_v49 = vld [vmem:[%s1587_s9 + $0x18] sm:$0xff] }
 0x238   : > { %896 = vmatpush.bf16.msra.mxu3 %v1099_v49 }
 0x23a   : > { %586 = vrot.lane.b32.xlu1 %v1460_v7, %s1307_s30  ;;  %v699_v59 = vpop.permute.xlu2 %698 }
 0x23b   : > { %v704_v62 = vsel %vm534_vm2, %v699_v59, 0 }
 0x23d   : > { %v1182_v52 = vpop.eup %1181 }
 0x23e   : > { %v692_v53 = vsel %vm497_vm1, %v1182_v52, 0.0 }
 0x23f   : > { %581 = vadd.xlane.f32.xlu0 %v580_v51 }
 0x247   : > { %693 = vadd.xlane.f32.xlu0 %v692_v53 }
 0x25b   : > { %642 = vrot.lane.b32.xlu0 %v1460_v7, %s1308_s15  ;;  %s950_s15 = scalar_lea.hbm %s1591_s13, %s1087_s21 }
 0x25c   : > { %s954_s0 = sshll.u32 %s950_s15, 4  ;;  %s955_s0 = int_to_ptr.hbm [resolvable:$true] %s954_s0 }
 0x25d   : > { %s1241_s22 = sshra.s32 %s955_s0, 4  ;;  %s1242_s22 = int_to_ptr.hbm [resolvable:$true] %s1241_s22 }
 0x25e   : > { %s1243_s21 = scalar_lea.hbm %s1242_s22, 8  ;;  %p1248_p3 = scmp.lt.s32.totalorder %s1242_s22, %s1591_s13 }
 0x25f   : > { %p1244_p0 = scmp.ne.s32.totalorder %s1242_s22, %s1243_s21 }
 0x261   : > { %p1245_p1 = pnand %p1244_p0, %p1421_p5 }
 0x263   : > { %p1246_p2 = pneg %p1245_p1 }
 0x294   : > { %v525_v54 = vpop.xlane.xlu1 %524 }
 0x295   : > { %1183 = vrcp.f32 %v525_v54  ;;  %v1097_v54 = vld [vmem:[%s1587_s9 + $0x8] sm:$0xff] }
 0x29b   : > { %v1184_v55 = vpop.eup %1183 }
 0x29c   : > { %v527_v56 = vmul.f32 %v1184_v55, %v1176_v35 }
 0x29e   : > { %v528_v57 = vpack.c.bf16 %v527_v56, %v527_v56 }
 0x2a0   : > { %1044 = vmatmul.msk.bf16.vlgmr.msra.gmra.mxu2 %vm497_vm1, %v528_v57 }
 0x2aa   : > { %v638_v58 = vpop.xlane.xlu0 %637 }
 0x2ac   : > { %v587_v60 = vpop.permute.xlu1 %586 }
 0x2ad   : > { %v592_v61 = vsel %vm534_vm2, %v587_v60, 0 }
 0x2ae   : > { %601 = vmatpush.bf16.msrb.mxu2 %v592_v61  ;;  %v1169_v61 = vld [vmem:[%s1583_s5] ss:$0 sm:$0xff] }
 0x2b2   : > { %713 = vmatpush.bf16.msra.mxu2 %v704_v62  ;;  %v582_v63 = vpop.xlane.xlu0 %581 }
 0x2b3   : > { %1185 = vrcp.f32 %v582_v63  ;;  %v1170_v63 = vld [vmem:[%s1584_s6] ss:$0 sm:$0xff] }
 0x2b9   : > { %v1186_v0 = vpop.eup %1185 }
 0x2ba   : > { %v584_v1 = vmul.f32 %v1186_v0, %v1180_v50  ;;  %v694_v3 = vpop.xlane.xlu0 %693 }
 0x2bb   : > { %1187 = vrcp.f32 %v694_v3 }
 0x2bc   : > { %v585_v4 = vpack.c.bf16 %v584_v1, %v584_v1  ;;  %1189 = vrcp.f32 %v638_v58 }
 0x2bd   : > { %1191 = vrcp.f32 %v1312_v36 }
 0x2be   : > { %1046 = vmatmul.msk.bf16.vlgmr.msrb.gmra.mxu2 %vm497_vm1, %v585_v4 }
 0x2c1   : > { %v1188_v5 = vpop.eup %1187 }
 0x2c2   : > { %v696_v6 = vmul.f32 %v1188_v5, %v1182_v52  ;;  %v1190_v7 = vpop.eup %1189  ;;  %v1098_v52 = vld [vmem:[%s1587_s9 + $0x10] sm:$0xff]  ;;  %v1096_v5 = vld [vmem:[%s1587_s9] sm:$0xff] }
 0x2c3   : > { %v640_v8 = vmul.f32 %v1190_v7, %v1178_v46  ;;  %v1192_v37 = vpop.eup %1191  ;;  %897 = vmatpush.bf16.msra.mxu3 %v1098_v52 }
 0x2c4   : > { %v697_v9 = vpack.c.bf16 %v696_v6, %v696_v6  ;;  %v780_v38 = vmul.f32 32.0, %v1192_v37  ;;  %vm784_vm5 = vweird.f32 %v1192_v37  ;;  %v1171_v6 = vld [vmem:[%s1586_s8] ss:$0 sm:$0xff] }
 0x2c5   : > { %v641_v12 = vpack.c.bf16 %v640_v8, %v640_v8 }
 0x2c6   : > { %v781_v39 = vsub.f32 1.0, %v780_v38 }
 0x2c7   : > { %898 = vmatpush.bf16.msra.mxu3 %v1097_v54 }
 0x2c8   : > { %v782_v40 = vmul.f32 %v1192_v37, %v781_v39 }
 0x2ca   : > { %v783_v41 = vadd.f32 %v1192_v37, %v782_v40 }
 0x2cb   : > { %899 = vmatpush.bf16.msra.mxu3 %v1096_v5 }
 0x2cc   : > { %v785_v42 = vsel %vm784_vm5, %v1192_v37, %v783_v41 }
 0x2cd   : > { %v643_v10 = vpop.permute.xlu0 %642 }
 0x2ce   : > { %1050 = vmatmul.msk.bf16.vlgmr.msra.gmra.mxu2 %vm497_vm1, %v697_v9  ;;  %v648_v11 = vsel %vm534_vm2, %v643_v10, 0 }
 0x2cf   : > { %657 = vmatpush.bf16.msrb.mxu1 %v648_v11 }
 0x2d2   : > { %1048 = vmatmul.msk.bf16.vlgmr.msrb.gmra.mxu1 %vm497_vm1, %v641_v12  ;;  %v1172_v12 = vld [vmem:[%s1588_s10] ss:$0 sm:$0xff] }
 0x323   : > { %v547_v13 = vpop.f32.mrf.mxu2 }
 0x32b   : > { %v549_v14 = vpop.f32.mrf.mxu2 }
 0x341   : > { %v603_v15 = vpop.f32.mrf.mxu2 }
 0x342   : > { %720 = vrot.lane.b32.xlu1 %v603_v15, %s1309_s27 }
 0x349   : > { %v605_v16 = vpop.f32.mrf.mxu2 }
 0x34f   : > { %v659_v17 = vpop.f32.mrf.mxu1 }
 0x350   : > { %724 = vrot.lane.b32.xlu2 %v659_v17, %s1310_s7 }
 0x351   : > { %v715_v18 = vpop.f32.mrf.mxu2 }
 0x352   : > { %728 = vrot.lane.b32.xlu1 %v715_v18, %s1311_s17  ;;  %s448_s17 = scalar_lea.vmem [#allocation5], %s1032_s20  ;;  %s1247_s20 = scalar_lea.hbm %s1591_s13, 16 }
 0x353   : > { %s952_s29 = sshll.u32 %s448_s17, 4  ;;  %p1249_p4 = scmp.lt.s32.totalorder %s1247_s20, %s1243_s21  ;;  %s953_s29 = int_to_ptr.vmem [resolvable:$true] %s952_s29 }
 0x355   : > { %p1250_p7 = por %p1249_p4, %p1248_p3 }
 0x357   : > { %v661_v19 = vpop.f32.mrf.mxu1  ;;  %p1251_p8 = pnand %p1250_p7, %p1246_p2 }
 0x359   : > { %v717_v20 = vpop.f32.mrf.mxu2 }
 0x3aa   : > { %v725_v25 = vpop.permute.xlu2 %724 }
 0x3b4   : > { %v721_v23 = vpop.permute.xlu1 %720 }
 0x3b5   : > { %v731_v24 = vsel %vm497_vm1, %v547_v13, %v721_v23 }
 0x3b6   : > { %v733_v27 = vsel %vm732_vm3, %v731_v24, %v725_v25 }
 0x3c4   : > { %v729_v26 = vpop.permute.xlu1 %728 }
 0x3c5   : > { %v735_v28 = vsel %vm734_vm4, %v733_v27, %v729_v26 }
 0x3c6   : > { %v740_v29 = vpack.c.bf16 %v735_v28, %v735_v28 }
 0x3c8   : > { %1059 = vmatmul.msk.bf16.vlgmr.msra.gmra.mxu0 %vm476_vm0, %v740_v29 }
 0x445   : > { %v769_v31 = vpop.f32.mrf.mxu0 }
 0x446   : > { %v770_v32 = vadd.f32 %v1168_v30, %v769_v31 }
 0x448   : > { %v773_v33 = vadd.f32 %v770_v32, %v1452_v2  ;;  %v1095_v2 = vld [vmem:[#allocation2 + $0x8] sm:$0xff]  ;;  %v1173_v32 = vld [vmem:[%s1589_s11] ss:$0 sm:$0xff] }
 0x449   : > { %843 = vmatpush.bf16.msra.mxu1 %v1095_v2 }
 0x44a   : > { %v776_v34 = vsel %vm476_vm0, %v773_v33, 0.0 }
 0x44b   : > { %777 = vadd.xlane.f32.xlu2 %v776_v34 }
 0x44d   : > { %v771_v35 = vpop.f32.mrf.mxu0  ;;  %844 = vmatpush.bf16.msra.mxu1 %v1094_v48 }
 0x44e   : > { %v1174_v35 = vld [vmem:[%s1590_s12] ss:$0 sm:$0xff] }
 0x4be   : > { %v778_v43 = vpop.xlane.xlu2 %777 }
 0x4bf   : > { %v786_v44 = vmul.f32 %v785_v42, %v778_v43 }
 0x4c1   : > { %v787_v45 = vsub.f32 %v773_v33, %v786_v44 }
 0x4c3   : > { %v788_v46 = vmul.f32 %v787_v45, %v787_v45 }
 0x4c5   : > { %v789_v47 = vsel %vm476_vm0, %v788_v46, 0.0 }
 0x4c6   : > { %790 = vadd.xlane.f32.xlu1 %v789_v47 }
 0x539   : > { %v791_v50 = vpop.xlane.xlu1 %790 }
 0x53a   : > { %v792_v51 = vmul.f32 %v791_v50, %v785_v42 }
 0x53c   : > { %v793_v53 = vadd.f32 1e-05, %v792_v51 }
 0x53e   : > { %1193 = vrsqrt.f32 %v793_v53  ;;  %vm800_vm7 = vweird.f32 %v793_v53 }
 0x544   : > { %v1194_v55 = vpop.eup %1193 }
 0x545   : > { %v795_v56 = vmul.f32 %v1194_v55, %v793_v53  ;;  %vm801_vm6 = vweird.f32 %v1194_v55 }
 0x546   : > { %vm802_vm8 = vmor %vm800_vm7, %vm801_vm6 }
 0x547   : > { %v796_v57 = vmul.f32 %v1194_v55, %v795_v56 }
 0x549   : > { %v797_v58 = vmul.f32 0.5, %v796_v57 }
 0x54b   : > { %v798_v59 = vsub.f32 1.5, %v797_v58 }
 0x54d   : > { %v799_v60 = vmul.f32 %v1194_v55, %v798_v59 }
 0x54f   : > { %v803_v62 = vsel %vm802_vm8, %v1194_v55, %v799_v60 }
 0x550   : > { %v804_v0 = vmul.f32 %v803_v62, %v787_v45 }
 0x552   : > { %v808_v1 = vmul.f32 %v1169_v61, %v804_v0 }
 0x554   : > { %v812_v3 = vadd.f32 %v1170_v63, %v808_v1 }
 0x556   : > { %v817_v4 = vpack.c.bf16 %v812_v3, %v812_v3 }
 0x558   : > { %1068 = vmatmul.msk.bf16.vlgmr.msra.gmra.mxu1 %vm476_vm0, %v817_v4 }
 0x5d5   : > { %v846_v7 = vpop.f32.mrf.mxu1 }
 0x5d6   : > { %v847_v8 = vadd.f32 %v1171_v6, %v846_v7 }
 0x5d8   : > { %v850_v9 = vmax.f32 %v847_v8, 0.0 }
 0x5da   : > { %v859_v10 = vpack.c.bf16 %v850_v9, %v850_v9 }
 0x5dc   : > { %1085 = vmatmul.msk.bf16.vlgmr.msra.gmra.mxu3 %vm888_vm9, %v859_v10 }
 0x5dd   : > { %v848_v11 = vpop.f32.mrf.mxu1 }
 0x65f   : > { %v901_v13 = vpop.f32.mrf.mxu3 }
 0x660   : > { %v902_v14 = vadd.f32 %v1172_v12, %v901_v13 }
 0x662   : > { %v905_v15 = vadd.f32 %v902_v14, %v812_v3 }
 0x664   : > { %v908_v16 = vsel %vm476_vm0, %v905_v15, 0.0 }
 0x665   : > { %909 = vadd.xlane.f32.xlu0 %v908_v16 }
 0x667   : > { %v903_v17 = vpop.f32.mrf.mxu3 }
 0x6d8   : > { %v910_v18 = vpop.xlane.xlu0 %909 }
 0x6d9   : > { %v911_v19 = vmul.f32 %v910_v18, %v785_v42 }
 0x6db   : > { %v912_v20 = vsub.f32 %v905_v15, %v911_v19 }
 0x6dd   : > { %v913_v21 = vmul.f32 %v912_v20, %v912_v20 }
 0x6df   : > { %v914_v22 = vsel %vm476_vm0, %v913_v21, 0.0 }
 0x6e0   : > { %915 = vadd.xlane.f32.xlu2 %v914_v22 }
 0x753   : > { %v916_v23 = vpop.xlane.xlu2 %915 }
 0x754   : > { %v917_v24 = vmul.f32 %v916_v23, %v785_v42 }
 0x756   : > { %v918_v25 = vadd.f32 1e-05, %v917_v24 }
 0x758   : > { %1195 = vrsqrt.f32 %v918_v25  ;;  %vm925_vm11 = vweird.f32 %v918_v25 }
 0x75e   : > { %v1196_v26 = vpop.eup %1195 }
 0x75f   : > { %v920_v27 = vmul.f32 %v1196_v26, %v918_v25  ;;  %vm926_vm10 = vweird.f32 %v1196_v26 }
 0x760   : > { %vm927_vm12 = vmor %vm925_vm11, %vm926_vm10 }
 0x761   : > { %v921_v28 = vmul.f32 %v1196_v26, %v920_v27 }
 0x763   : > { %v922_v29 = vmul.f32 0.5, %v921_v28 }
 0x765   : > { %v923_v30 = vsub.f32 1.5, %v922_v29 }
 0x767   : > { %v924_v31 = vmul.f32 %v1196_v26, %v923_v30 }
 0x769   : > { %v928_v33 = vsel %vm927_vm12, %v1196_v26, %v924_v31 }
 0x76a   : > { %v929_v34 = vmul.f32 %v928_v33, %v912_v20 }
 0x76c   : > { %v933_v36 = vmul.f32 %v1173_v32, %v929_v34 }
 0x76e   : > { %v937_v37 = vadd.f32 %v1174_v35, %v933_v36 }
 0x770   : > { %938 = vst.msk [vmem:[%s448_s17] sm:$0xff] %vm476_vm0, %v937_v37 }
 0x771   : > { %1254 = shalt.err (!%p1251_p8)
}
 0x772   : > { %1104 = dma.vmem_to_hbm [thread:$0]  (%p1421_p5), %s953_s29, 128, %s955_s0, %s940_s23  }
 0x773 PF: > { %p1116_p9 = scmp.ge.s32.totalorder %s1293_s28, 2  ;;  %s966_s16 = sand.u32 1, %s1281_s25  }
 0x774   : > { %s967_s7 = scalar_lea.sflag [#allocation4], %s966_s16 }
 0x775   : > { %p1111_p10 = pnand %p1116_p9, %p1425_p6 }
 0x777   : > { %p1112_p11 = pneg %p1111_p10 }
 0x779   : > { %1276 = dma.done.wait (%p1112_p11), %s967_s7, 128  }
 0x77a   : > { %1278 = vsyncadd (%p1112_p11), %s967_s7, 4294967168  ;;  %s1601_s17 = sld [smem:[#allocation8_spill]]  ;;  %p24_p12 = scmp.ge.s32.totalorder %s1408_s14, 4  }
 0x77b   : > { %s1602_s27 = sld [smem:[#allocation9_spill]]  ;;  %s1603_s25 = smov %s1285_s26 }
 0x77c   : > { %s1605_s28 = smov %s1408_s14  ;;  %26 = sbr.rel (!%p24_p12) target bundleno = 7 (0x7), region = 112 }
 0x780   : > { %s1604_s26 = smov %s1601_s17 }
 0x781   :  { %973 = vsyncpa [#allocation3], 1 }
 0x782   :  { %975 = vsyncpa [#allocation3 + $0x1], 1 }
 0x783   :  { %976 = vsyncpa [#allocation4], 1 }
 0x784   :  { %978 = vsyncpa [#allocation4 + $0x1], 1 }

</bundles_post_ra>
